<compile_context>
chip_gen: v5e
topology: v5e:2x2
jax: 0.10.0
libtpu: 0.0.40
codegen_flags: <defaults>
</compile_context>

<pallas_src>
import math

import jax
import jax.numpy as jnp
from jax import lax
from jax.experimental import pallas as pl
from jax.experimental.pallas import tpu as pltpu


def _round_up(x: int, m: int) -> int:
    return (x + m - 1) // m * m


def _time_encoder_kernel(t_ref, w_ref, b_ref, o_ref):
    """One grid step.

    t_ref : (tile_r, F)  F consecutive timestamps packed per kernel row
    w_ref : (1, W)       weight tiled F times along lanes, W = F*C (multiple of 128)
    b_ref : (1, W)       bias tiled F times along lanes
    o_ref : (tile_r, W)  lane-dense output; reshapes (free) to (tile_r*F, C)
    """
    t = t_ref[...]                                   # (tile_r, F) f32
    tile_r, fold = t.shape
    w_lanes = o_ref.shape[-1]
    c = w_lanes // fold

    # Lane-expand t so lane j of row r holds t[r, j // C].  Built with
    # broadcasts + compares/selects only (all plain VPU ops that co-issue
    # under the EUP cos and the stores).
    t_wide = jnp.broadcast_to(t[:, 0:1], (tile_r, w_lanes))
    if fold > 1:
        lane = lax.broadcasted_iota(jnp.int32, (tile_r, w_lanes), 1)
        for f in range(1, fold):
            t_wide = jnp.where(lane >= f * c, t[:, f:f + 1], t_wide)

    # Linear(1, C) is a per-lane scale+shift; keep it off the MXU.
    o_ref[...] = jnp.cos(t_wide * w_ref[...] + b_ref[...])


def time_encoder(t, weight, bias, *, block_rows=512):
    """Pallas TPU equivalent of TimeEncoder.forward: cos(lin(t.view(-1, 1))).

    t      : any shape (flattened to N timestamps)
    weight : (C, 1)  Linear(1, C) weight
    bias   : (C,)    Linear(1, C) bias
    returns: (N, C) float32
    """
    C = int(weight.shape[0])
    t_flat = jnp.asarray(t, jnp.float32).reshape(-1)
    N = int(t_flat.shape[0])

    # Fold factor so the kernel lane axis is a multiple of 128 (lane-dense).
    W = C * 128 // math.gcd(C, 128)
    F = W // C

    R = pl.cdiv(N, F)                                 # kernel rows needed
    tile_r = min(block_rows, _round_up(max(R, 1), 8)) # big tiles, but don't over-pad tiny N
    R_pad = _round_up(R, tile_r)
    N_pad = R_pad * F

    if N_pad != N:
        t_flat = jnp.pad(t_flat, (0, N_pad - N))
    t_fold = t_flat.reshape(R_pad, F)                 # (R_pad, F)

    w_tiled = jnp.tile(weight.reshape(1, C).astype(jnp.float32), (1, F))  # (1, W)
    b_tiled = jnp.tile(bias.reshape(1, C).astype(jnp.float32), (1, F))    # (1, W)

    out_fold = pl.pallas_call(
        _time_encoder_kernel,
        out_shape=jax.ShapeDtypeStruct((R_pad, W), jnp.float32),
        grid=(R_pad // tile_r,),
        in_specs=[
            pl.BlockSpec((tile_r, F), lambda i: (i, 0)),   # timestamps (per step)
            pl.BlockSpec((1, W), lambda i: (0, 0)),        # weight (tiny, resident block)
            pl.BlockSpec((1, W), lambda i: (0, 0)),        # bias   (tiny, resident block)
        ],
        out_specs=pl.BlockSpec((tile_r, W), lambda i: (i, 0)),
        compiler_params=pltpu.CompilerParams(
            dimension_semantics=("parallel",)),
    )(t_fold, w_tiled, b_tiled)

    # (R_pad, W) -> (N_pad, C) is a row-major identity reshape (no data movement).
    out = out_fold.reshape(N_pad, C)
    return out[:N] if N_pad != N else out


if __name__ == "__main__":
    key = jax.random.PRNGKey(0)
    k_t, k_w, k_b = jax.random.split(key, 3)

    out_channels = 32

    # torch.nn.Linear(1, C) init: U(-1/sqrt(in_features), +1/sqrt(in_features)), in_features=1.
    weight = jax.random.uniform(k_w, (out_channels, 1), jnp.float32, -1.0, 1.0)
    bias = jax.random.uniform(k_b, (out_channels,), jnp.float32, -1.0, 1.0)

    def reference(ts):
        # Exact elementwise f32 reference (Linear(1,C) == scale+shift).
        return jnp.cos(ts.reshape(-1, 1) * weight.reshape(1, -1) + bias.reshape(1, -1))

    # Small shape implied by the module: batch=2, seq=8 -> N=16 (exercises tail padding).
    t_small = jax.random.uniform(k_t, (2, 8), jnp.float32, 0.0, 100.0)
    out_small = jax.block_until_ready(time_encoder(t_small, weight, bias))
    assert out_small.shape == (16, out_channels)
    assert jnp.allclose(out_small, reference(t_small), atol=1e-4, rtol=1e-4)

    # Ragged, multi-grid-step case: N=3000 -> 750 kernel rows -> 2 grid steps of 512 + tail pad.
    t_big = jax.random.uniform(jax.random.PRNGKey(1), (3, 1000), jnp.float32, 0.0, 100.0)
    out_big = jax.block_until_ready(time_encoder(t_big, weight, bias))
    assert out_big.shape == (3000, out_channels)
    assert jnp.allclose(out_big, reference(t_big), atol=1e-4, rtol=1e-4)

    print("KERNEL_OK")
</pallas_src>

<mosaic_0001>
module attributes {stable_mosaic.version = 11 : i64} {
  func.func @_time_encoder_kernel(%arg0: i32, %arg1: memref<8x4xf32, #tpu.memory_space<vmem>>, %arg2: memref<1x128xf32, #tpu.memory_space<vmem>>, %arg3: memref<1x128xf32, #tpu.memory_space<vmem>>, %arg4: memref<8x128xf32, #tpu.memory_space<vmem>>) attributes {dimension_semantics = [#tpu.dimension_semantics<parallel>], iteration_bounds = array<i64: 1>, scalar_prefetch = 0 : i64, scratch_operands = 0 : i64, tpu.core_type = #tpu.core_type<tc>, window_params = [{transform_indices = @transform_0, window_bounds = array<i64: 8, 4>}, {pipeline_mode = #tpu.pipeline_mode<synchronous>, transform_indices = @transform_1, window_bounds = array<i64: 1, 128>}, {pipeline_mode = #tpu.pipeline_mode<synchronous>, transform_indices = @transform_2, window_bounds = array<i64: 1, 128>}, {transform_indices = @transform_3, window_bounds = array<i64: 8, 128>}]} {
    %c0 = arith.constant 0 : index
    %c0_0 = arith.constant 0 : index
    %0 = vector.load %arg1[%c0, %c0_0] : memref<8x4xf32, #tpu.memory_space<vmem>>, vector<8x4xf32>
    %1 = vector.extract_strided_slice %0 {offsets = [0, 0], sizes = [8, 1], strides = [1, 1]} : vector<8x4xf32> to vector<8x1xf32>
    %2 = vector.shape_cast %1 : vector<8x1xf32> to vector<8x1xf32>
    %3 = vector.broadcast %2 : vector<8x1xf32> to vector<8x128xf32>
    %4 = tpu.iota {dimensions = array<i32: 1>} : vector<8x128xi32>
    %c32_i32 = arith.constant 32 : i32
    %5 = vector.broadcast %c32_i32 : i32 to vector<8x128xi32>
    %6 = arith.cmpi sge, %4, %5 : vector<8x128xi32>
    %7 = vector.extract_strided_slice %0 {offsets = [0, 1], sizes = [8, 1], strides = [1, 1]} : vector<8x4xf32> to vector<8x1xf32>
    %8 = vector.shape_cast %7 : vector<8x1xf32> to vector<8x1xf32>
    %9 = vector.broadcast %8 : vector<8x1xf32> to vector<8x128xf32>
    %10 = arith.select %6, %9, %3 : vector<8x128xi1>, vector<8x128xf32>
    %c64_i32 = arith.constant 64 : i32
    %11 = vector.broadcast %c64_i32 : i32 to vector<8x128xi32>
    %12 = arith.cmpi sge, %4, %11 : vector<8x128xi32>
    %13 = vector.extract_strided_slice %0 {offsets = [0, 2], sizes = [8, 1], strides = [1, 1]} : vector<8x4xf32> to vector<8x1xf32>
    %14 = vector.shape_cast %13 : vector<8x1xf32> to vector<8x1xf32>
    %15 = vector.broadcast %14 : vector<8x1xf32> to vector<8x128xf32>
    %16 = arith.select %12, %15, %10 : vector<8x128xi1>, vector<8x128xf32>
    %c96_i32 = arith.constant 96 : i32
    %17 = vector.broadcast %c96_i32 : i32 to vector<8x128xi32>
    %18 = arith.cmpi sge, %4, %17 : vector<8x128xi32>
    %19 = vector.extract_strided_slice %0 {offsets = [0, 3], sizes = [8, 1], strides = [1, 1]} : vector<8x4xf32> to vector<8x1xf32>
    %20 = vector.shape_cast %19 : vector<8x1xf32> to vector<8x1xf32>
    %21 = vector.broadcast %20 : vector<8x1xf32> to vector<8x128xf32>
    %22 = arith.select %18, %21, %16 : vector<8x128xi1>, vector<8x128xf32>
    %c0_1 = arith.constant 0 : index
    %c0_2 = arith.constant 0 : index
    %23 = vector.load %arg2[%c0_1, %c0_2] : memref<1x128xf32, #tpu.memory_space<vmem>>, vector<1x128xf32>
    %24 = vector.broadcast %23 : vector<1x128xf32> to vector<8x128xf32>
    %25 = arith.mulf %22, %24 : vector<8x128xf32>
    %c0_3 = arith.constant 0 : index
    %c0_4 = arith.constant 0 : index
    %26 = vector.load %arg3[%c0_3, %c0_4] : memref<1x128xf32, #tpu.memory_space<vmem>>, vector<1x128xf32>
    %27 = vector.broadcast %26 : vector<1x128xf32> to vector<8x128xf32>
    %28 = arith.addf %25, %27 : vector<8x128xf32>
    %29 = math.cos %28 : vector<8x128xf32>
    %c0_5 = arith.constant 0 : index
    %c0_6 = arith.constant 0 : index
    %30 = vector.load %arg4[%c0_5, %c0_6] : memref<8x128xf32, #tpu.memory_space<vmem>>, vector<8x128xf32>
    tpu.vector_store %arg4[%c0_5, %c0_6], %29 {strides = array<i32>} : memref<8x128xf32, #tpu.memory_space<vmem>>, vector<8x128xf32>,
    return
  }
  func.func @transform_0(%arg0: i32) -> (i32, i32) {
    %c0_i32 = arith.constant 0 : i32
    %c0_i32_0 = arith.constant 0 : i32
    return %arg0, %c0_i32 : i32, i32
  }
  func.func @transform_1(%arg0: i32) -> (i32, i32) {
    %c0_i32 = arith.constant 0 : i32
    %c0_i32_0 = arith.constant 0 : i32
    %c0_i32_1 = arith.constant 0 : i32
    return %c0_i32, %c0_i32_0 : i32, i32
  }
  func.func @transform_2(%arg0: i32) -> (i32, i32) {
    %c0_i32 = arith.constant 0 : i32
    %c0_i32_0 = arith.constant 0 : i32
    %c0_i32_1 = arith.constant 0 : i32
    return %c0_i32, %c0_i32_0 : i32, i32
  }
  func.func @transform_3(%arg0: i32) -> (i32, i32) {
    %c0_i32 = arith.constant 0 : i32
    %c0_i32_0 = arith.constant 0 : i32
    return %arg0, %c0_i32 : i32, i32
  }
}

</mosaic_0001>

<bundles_post_ra>
// kernel: tpu_custom_call.1
= control target key start
LH: loop header
LB: loop body
LE: loop exit
PB: predicated region body
PF: predicated region fallthrough
CT: control target
= control target key end

     0   :  { %v269_v1 = vmov 0   ;;  %v270_v2 = vmov 2   ;;  %s381_s0 = inlined_call_operand.vmem [shape: f32[8,4], index: 0, kind: input, shape index: {}]   ;;  %s382_s1 = inlined_call_operand.vmem [shape: f32[1,128], index: 1, kind: input, shape index: {}]   ;;  %s383_s2 = inlined_call_operand.vmem [shape: f32[1,128], index: 2, kind: input, shape index: {}]   ;;  %s384_s3 = inlined_call_operand.hbm [shape: f32[8,128], index: 3, kind: output, shape index: {}]  }
   0x1   :  { %v15_v0 = vld [vmem:[%s381_s0] sm:$0xff]  ;;  %236 = vset.pattern.permute.xlu0 %v269_v1  ;;  %238 = vset.pattern.permute.xlu1 %v270_v2 }
   0x2   :  { %8 = vsyncpa [#allocation3], 0  ;;  %18 = vperm.xlu0 %236, %v15_v0   ;;  %31 = vperm.xlu1 %238, %v15_v0   ;;  %v271_v3 = vmov 1   ;;  %v272_v4 = vmov 3   ;;  %v21_v5 = vlaneseq  ;;  %v241_v10 = vld [vmem:[%s382_s1] ss:$0 sm:$0xff] }
   0x3   :  { %v242_v13 = vld [vmem:[%s383_s2] ss:$0 sm:$0xff]  ;;  %v273_v29 = vmov 683565275   ;;  %v274_v31 = vmov 2475754826  }
   0x4   :  { %v22_v8 = vand.u32 127, %v21_v5  ;;  %v275_v34 = vmov 2131351028   ;;  %v276_v37 = vmov 2102212464   ;;  %s279_s1 = smov [#allocation2]  }
   0x5   :  { %v277_v40 = vmov 920167782   ;;  %v278_v43 = vmov 1326507024   ;;  %s211_s2 = sshll.u32 %s279_s1, 4  ;;  %s213_s19 = sshll.u32 %s384_s3, 4  ;;  %s212_s2 = int_to_ptr.vmem [resolvable:$true] %s211_s2  ;;  %s214_s19 = int_to_ptr.hbm [resolvable:$true] %s213_s19 }
   0x6   :  { %vm23_vm0 = vcmp.ge.s32.totalorder %v22_v8, 32  ;;  %vm29_vm1 = vcmp.ge.s32.totalorder %v22_v8, 64  ;;  %vm35_vm2 = vcmp.ge.s32.totalorder %v22_v8, 96 }
   0xa   :  { %237 = vset.pattern.permute.xlu0 %v271_v3  ;;  %239 = vset.pattern.permute.xlu1 %v272_v4 }
   0xb   :  { %25 = vperm.xlu0 %237, %v15_v0   ;;  %37 = vperm.xlu1 %239, %v15_v0  }
  0x13   :  { %240 = vset.pattern.permute.xlu0 %v272_v4 }
  0x74   :  { %v19_v6 = vpop.permute.xlu0 %18  ;;  %v32_v7 = vpop.permute.xlu1 %31 }
  0x7d   :  { %v26_v9 = vpop.permute.xlu0 %25  ;;  %v38_v11 = vpop.permute.xlu1 %37 }
  0x7e   :  { %v28_v12 = vsel %vm23_vm0, %v26_v9, %v19_v6 }
  0x7f   :  { %v34_v14 = vsel %vm29_vm1, %v32_v7, %v28_v12 }
  0x80   :  { %v40_v15 = vsel %vm35_vm2, %v38_v11, %v34_v14 }
  0x81   :  { %v45_v16 = vmul.f32 %v241_v10, %v40_v15 }
  0x83   :  { %v310_v17 = vadd.f32 %v242_v13, %v45_v16 }
  0x85   :  { %v54_v18 = vand.u32 2139095040, %v310_v17  ;;  %v51_v21 = vand.u32 2147483647, %v310_v17  ;;  %vm53_vm15 = vcmp.lt.s32.totalorder %v310_v17, 0 }
  0x87   :  { %v55_v19 = vshrl.u32 %v54_v18, 23  ;;  %v58_v24 = vand.u32 8388607, %v51_v21  ;;  %vm368_vm0 = vcmp.le.f32.partialorder %v51_v21, 0.7853982 }
  0x89   :  { %v222_v20 = vadd.s32 4294967169, %v55_v19  ;;  %v59_v28 = vor.u32 8388608, %v58_v24 }
  0x8b   :  { %v61_v22 = vadd.s32 1, %v222_v20  ;;  %v327_v50 = vshll.u32 %v59_v28, 8 }
  0x8d   :  { %vm62_vm3 = vcmp.gt.s32.totalorder %v61_v22, 0  ;;  %v100_v59 = vand.u32 65535, %v327_v50  ;;  %v101_v60 = vshrl.u32 %v327_v50, 16 }
  0x8e   :  { %v63_v23 = vsel %vm62_vm3, %v61_v22, 0 }
  0x8f   :  { %v65_v25 = vand.u32 31, %v63_v23  ;;  %v318_v27 = vshrl.u32 %v63_v23, 5 }
  0x91   :  { %v316_v26 = vsub.s32 32, %v65_v25  ;;  %v68_v30 = vshll.u32 %v273_v29, %v65_v25  ;;  %v71_v32 = vshll.u32 %v274_v31, %v65_v25  ;;  %v74_v36 = vshll.u32 %v275_v34, %v65_v25 }
  0x92   :  { %v77_v39 = vshll.u32 %v276_v37, %v65_v25  ;;  %v80_v42 = vshll.u32 %v277_v40, %v65_v25  ;;  %vm83_vm4 = vcmp.lt.s32.totalorder %v318_v27, 1  ;;  %vm86_vm5 = vcmp.lt.s32.totalorder %v318_v27, 4 }
  0x93   :  { %v69_v33 = vshrl.u32 %v274_v31, %v316_v26  ;;  %v72_v35 = vshrl.u32 %v275_v34, %v316_v26  ;;  %v75_v38 = vshrl.u32 %v276_v37, %v316_v26  ;;  %v78_v41 = vshrl.u32 %v277_v40, %v316_v26 }
  0x94   :  { %v81_v44 = vshrl.u32 %v278_v43, %v316_v26  ;;  %vm85_vm6 = vcmp.lt.s32.totalorder %v318_v27, 3  ;;  %vm84_vm7 = vcmp.lt.s32.totalorder %v318_v27, 2  ;;  %v67_v24 = vshrl.u32 %v273_v29, %v316_v26 }
  0x95   :  { %v70_v45 = vor.u32 %v69_v33, %v68_v30  ;;  %v73_v46 = vor.u32 %v72_v35, %v71_v32  ;;  %v76_v47 = vor.u32 %v75_v38, %v74_v36  ;;  %v79_v48 = vor.u32 %v78_v41, %v77_v39 }
  0x96   :  { %v82_v49 = vor.u32 %v81_v44, %v80_v42 }
  0x97   :  { %v91_v51 = vsel %vm83_vm4, %v70_v45, %v73_v46  ;;  %v95_v52 = vsel %vm83_vm4, %v73_v46, %v76_v47  ;;  %v92_v53 = vsel %vm86_vm5, %v79_v48, 920167782  ;;  %v88_v20 = vsel %vm86_vm5, %v76_v47, 2102212464 }
  0x98   :  { %v96_v54 = vsel %vm86_vm5, %v82_v49, 1326507024  ;;  %v93_v55 = vsel %vm85_vm6, %v76_v47, %v92_v53  ;;  %v87_v33 = vsel %vm83_vm4, %v67_v24, %v70_v45  ;;  %v89_v34 = vsel %vm85_vm6, %v73_v46, %v88_v20 }
  0x99   :  { %v97_v56 = vsel %vm85_vm6, %v79_v48, %v96_v54  ;;  %v94_v57 = vsel %vm84_vm7, %v91_v51, %v93_v55  ;;  %v90_v26 = vsel %vm84_vm7, %v87_v33, %v89_v34  ;;  %vm194_vm4 = vweird.f32 %v310_v17 }
  0x9a   :  { %v98_v58 = vsel %vm84_vm7, %v95_v52, %v97_v56  ;;  %v124_v63 = vand.u32 65535, %v94_v57  ;;  %v125_v0 = vshrl.u32 %v94_v57, 16  ;;  %v144_v41 = vmul.u32 %v327_v50, %v90_v26 }
  0x9b   :  { %v102_v61 = vand.u32 65535, %v98_v58  ;;  %v103_v62 = vshrl.u32 %v98_v58, 16 }
  0x9c   :  { %v127_v4 = vmul.u32 %v125_v0, %v100_v59  ;;  %v128_v5 = vmul.u32 %v124_v63, %v101_v60  ;;  %v126_v9 = vmul.u32 %v124_v63, %v100_v59  ;;  %v129_v13 = vmul.u32 %v125_v0, %v101_v60 }
  0x9d   :  { %v105_v2 = vmul.u32 %v103_v62, %v100_v59  ;;  %v106_v3 = vmul.u32 %v102_v61, %v101_v60  ;;  %v104_v6 = vmul.u32 %v102_v61, %v100_v59  ;;  %v107_v8 = vmul.u32 %v103_v62, %v101_v60 }
  0x9e   :  { %v130_v10 = vshll.u32 %v127_v4, 16  ;;  %v132_v15 = vshll.u32 %v128_v5, 16  ;;  %v131_v31 = vshrl.u32 %v127_v4, 16  ;;  %v133_v37 = vshrl.u32 %v128_v5, 16 }
  0x9f   :  { %v108_v7 = vshll.u32 %v105_v2, 16  ;;  %v110_v11 = vshll.u32 %v106_v3, 16  ;;  %v109_v25 = vshrl.u32 %v105_v2, 16  ;;  %v111_v35 = vshrl.u32 %v106_v3, 16 }
  0xa0   :  { %vm134_vm9 = vc.u32 %v126_v9, %v130_v10  ;;  %v136_v16 = vadd.s32 %v130_v10, %v126_v9 }
  0xa1   :  { %vm112_vm8 = vc.u32 %v104_v6, %v108_v7  ;;  %v114_v12 = vadd.s32 %v108_v7, %v104_v6  ;;  %v135_v19 = vsel %vm134_vm9, 1, %v269_v1 }
  0xa2   :  { %v113_v14 = vsel %vm112_vm8, 1, %v269_v1  ;;  %v137_v23 = vadd.s32 %v135_v19, %v129_v13  ;;  %vm138_vm11 = vc.u32 %v136_v16, %v132_v15  ;;  %v140_v40 = vadd.s32 %v136_v16, %v132_v15 }
  0xa3   :  { %v115_v18 = vadd.s32 %v113_v14, %v107_v8  ;;  %vm116_vm10 = vc.u32 %v114_v12, %v110_v11  ;;  %v139_v30 = vsel %vm138_vm11, 1, %v269_v1 }
  0xa4   :  { %v117_v22 = vsel %vm116_vm10, 1, %v269_v1  ;;  %v141_v32 = vadd.s32 %v139_v30, %v137_v23 }
  0xa5   :  { %v119_v28 = vadd.s32 %v117_v22, %v115_v18 }
  0xa6   :  { %v142_v38 = vadd.s32 %v141_v32, %v131_v31 }
  0xa7   :  { %v120_v36 = vadd.s32 %v119_v28, %v109_v25 }
  0xa8   :  { %v143_v29 = vadd.s32 %v142_v38, %v133_v37 }
  0xa9   :  { %v121_v39 = vadd.s32 %v120_v36, %v111_v35 }
  0xaa   :  { %v147_v1 = vadd.s32 1, %v143_v29 }
  0xab   :  { %vm146_vm12 = vc.u32 %v121_v39, %v140_v40  ;;  %v145_v27 = vadd.s32 %v140_v40, %v121_v39 }
  0xac   :  { %v148_v42 = vsel %vm146_vm12, %v147_v1, %v143_v29 }
  0xad   :  { %v149_v43 = vadd.s32 %v148_v42, %v144_v41 }
  0xaf   :  { %v150_v44 = vadd.s32 536870912, %v149_v43 }
  0xb1   :  { %v151_v45 = vshrl.u32 %v150_v44, 30 }
  0xb3   :  { %v152_v47 = vshll.u32 %v151_v45, 30  ;;  %v175_v8 = vsub.s32 4, %v151_v45 }
  0xb5   :  { %v153_v46 = vsub.s32 %v149_v43, %v152_v47  ;;  %v176_v13 = vsel %vm53_vm15, %v175_v8, %v151_v45 }
  0xb6   :  { %v178_v21 = vsel %vm368_vm0, 0, %v176_v13 }
  0xb7   :  { %vm154_vm13 = vcmp.lt.s32.totalorder %v153_v46, 0  ;;  %v155_v48 = vsub.s32 0, %v153_v46  ;;  %v195_v22 = vand.u32 3, %v178_v21 }
  0xb9   :  { %v156_v49 = vsel %vm154_vm13, %v155_v48, %v153_v46  ;;  %vm197_vm1 = vcmp.eq.s32.totalorder %v195_v22, 0  ;;  %vm200_vm2 = vcmp.eq.s32.totalorder %v195_v22, 2  ;;  %vm196_vm3 = vcmp.lt.s32.totalorder %v195_v22, 2 }
  0xba   :  { %v157_v51 = vclz %v156_v49 }
  0xbc   :  { %v223_v52 = vadd.s32 4294967294, %v157_v51 }
  0xbe   :  { %vm224_vm14 = vcmp.lt.s32.totalorder %v223_v52, 0 }
  0xbf   :  { %v160_v53 = vsel %vm224_vm14, 0, %v223_v52 }
  0xc0   :  { %v161_v54 = vsub.s32 32, %v160_v53  ;;  %v165_v55 = vsub.s32 4294967266, %v160_v53  ;;  %v162_v56 = vshll.u32 %v153_v46, %v160_v53 }
  0xc2   :  { %v163_v57 = vshrl.u32 %v145_v27, %v161_v54  ;;  %v166_v58 = vadd.s32 127, %v165_v55 }
  0xc4   :  { %v164_v50 = vor.u32 %v163_v57, %v162_v56  ;;  %v167_v59 = vshll.u32 %v166_v58, 23 }
  0xc6   :  { %v168_v60 = vor.u32 4788187, %v167_v59  ;;  %v171_v62 = vcvt.s32.f32 %v164_v50 }
  0xc8   :  { %v169_v61 = vand.u32 2147483647, %v168_v60 }
  0xca   :  { %v172_v63 = vmul.f32 %v171_v62, %v169_v61 }
  0xcc   :  { %v173_v0 = vxor.u32 2147483648, %v172_v63 }
  0xce   :  { %v174_v3 = vsel %vm53_vm15, %v173_v0, %v172_v63 }
  0xcf   :  { %v177_v4 = vsel %vm368_vm0, %v310_v17, %v174_v3 }
  0xd0   :  { %v179_v5 = vmul.f32 %v177_v4, %v177_v4 }
  0xd2   :  { %v180_v6 = vmul.f32 -0.001358992, %v179_v5  ;;  %v187_v7 = vmul.f32 -0.00019511016, %v179_v5 }
  0xd4   :  { %v181_v9 = vadd.f32 0.041655596, %v180_v6  ;;  %v188_v10 = vadd.f32 0.008332121, %v187_v7 }
  0xd6   :  { %v182_v11 = vmul.f32 %v181_v9, %v179_v5  ;;  %v189_v12 = vmul.f32 %v188_v10, %v179_v5 }
  0xd8   :  { %v183_v14 = vadd.f32 -0.4999988, %v182_v11  ;;  %v190_v15 = vadd.f32 -0.16666654, %v189_v12 }
  0xda   :  { %v184_v16 = vmul.f32 %v183_v14, %v179_v5  ;;  %v191_v18 = vmul.f32 %v190_v15, %v179_v5 }
  0xdc   :  { %v185_v19 = vadd.f32 1.0, %v184_v16  ;;  %v192_v20 = vadd.f32 1.0, %v191_v18 }
  0xde   :  { %v193_v23 = vmul.f32 %v192_v20, %v177_v4  ;;  %v201_v24 = vxor.u32 2147483648, %v185_v19 }
  0xe0   :  { %v198_v25 = vxor.u32 2147483648, %v193_v23  ;;  %v202_v30 = vsel %vm200_vm2, %v201_v24, %v193_v23 }
  0xe2   :  { %v199_v28 = vsel %vm197_vm1, %v185_v19, %v198_v25 }
  0xe3   :  { %v203_v31 = vsel %vm196_vm3, %v199_v28, %v202_v30 }
  0xe4   :  { %v204_v32 = vsel %vm194_vm4, nan, %v203_v31 }
  0xe5   :  { %205 = vst [vmem:[#allocation2] sm:$0xff] %v204_v32 }
  0xe6   :  { %216 = dma.vmem_to_hbm [thread:$0]  %s212_s2, 128, %s214_s19, [#allocation3]  }
  0xe7   :  { %267 = dma.done.wait [#allocation3], 128  }
  0xe8   :  { %268 = vsyncadd [#allocation3], 4294967168 }
  0xe9   :  { %221 = vsyncpa [#allocation3], 1 }

</bundles_post_ra>
